<compile_context>
chip_gen: v7x
topology: tpu7x:2x2x1
jax: 0.10.0
libtpu: 0.0.40
codegen_flags: <defaults>
</compile_context>

<pallas_src>
import functools

import jax
import jax.numpy as jnp
import numpy as np
from jax.experimental import pallas as pl
from jax.experimental.pallas import tpu as pltpu


# ----------------------------- kernels ---------------------------------------
def _exp_spacing_kernel(x_ref, o_ref, *, eps, flip):
    # x_ref: (M+1, TB)  -- latent axis on sublanes, batch on lanes
    # o_ref: (M,   TB)
    x = x_ref[...].astype(jnp.float32)
    y = -jnp.log(eps + (1.0 - eps) * x)               # EUP log, full lane width
    d = y.shape[0]
    m = d - 1

    # running cumulative sum over the tiny latent axis: d-1 unrolled VPU adds
    acc = y[0:1, :]
    partials = [acc]
    for j in range(1, d):
        acc = acc + y[j:j + 1, :]
        partials.append(acc)
    total = partials[-1]                               # (1, TB)

    # one approx reciprocal on the EUP slot + 2 Newton steps -> ~f32-exact 1/total
    inv = pl.reciprocal(total, approx=True)
    inv = inv * (2.0 - total * inv)
    inv = inv * (2.0 - total * inv)

    rows = [partials[j] * inv for j in range(m)]
    if flip:                                           # fold descending flip into the store order
        rows = rows[::-1]
    o_ref[...] = jnp.concatenate(rows, axis=0).astype(o_ref.dtype)


def _scale_kernel(x_ref, o_ref, *, flip):
    # x_ref: (M, TB), o_ref: (M, TB)
    x = x_ref[...].astype(jnp.float32)
    m = x.shape[0]
    logx = jnp.log(x)
    # x[i] ** (1/(M-i)) = exp(log(x[i]) / (M-i)); cumprod via m-1 unrolled multiplies
    acc = jnp.exp(logx[0:1, :] * (1.0 / m))
    rows = [acc]
    for i in range(1, m):
        acc = acc * jnp.exp(logx[i:i + 1, :] * (1.0 / (m - i)))
        rows.append(acc)
    if flip:                                           # fold (not descending) flip into the store order
        rows = rows[::-1]
    o_ref[...] = jnp.concatenate(rows, axis=0).astype(o_ref.dtype)


# ----------------------------- wrapper ----------------------------------------
class OrderedUniformPallas:
    """JAX/Pallas port of OrderedUniform.

    transform_label in {'exponential_spacing', 'scale'}.
    """

    def __init__(self, num_objectives, descending=False,
                 transform_label="exponential_spacing", block_batch=16384):
        self.num_objectives = num_objectives
        self.descending = descending
        self.transform_label = transform_label
        if transform_label == "exponential_spacing":
            self.latent_dim = num_objectives + 1
        elif transform_label == "scale":
            self.latent_dim = num_objectives
        else:
            raise ValueError(transform_label)
        self.bounds = [(0.0, 1.0) for _ in range(self.latent_dim)]
        # batch-tile width in lanes; must be a multiple of 128 when tiling
        self.block_batch = max(128, (int(block_batch) // 128) * 128)

    def __call__(self, X):
        batch_shape = X.shape[:-1]
        d = X.shape[-1]
        assert d == self.latent_dim, (d, self.latent_dim)
        m = self.num_objectives

        x2 = X.reshape((-1, d))
        b = x2.shape[0]
        # layout plumbing: latent axis -> sublanes, batch -> 128-wide lane axis
        xt = x2.T                                       # (d, b)

        if self.transform_label == "exponential_spacing":
            eps = float(jnp.finfo(X.dtype).eps)         # matches torch.finfo(X.dtype).eps
            kernel = functools.partial(_exp_spacing_kernel, eps=eps,
                                       flip=bool(self.descending))
        else:  # scale
            kernel = functools.partial(_scale_kernel, flip=not self.descending)

        if b <= self.block_batch:
            tb, grid = b, (1,)
        else:
            tb, grid = self.block_batch, (pl.cdiv(b, self.block_batch),)

        out_t = pl.pallas_call(
            kernel,
            out_shape=jax.ShapeDtypeStruct((m, b), X.dtype),
            grid=grid,
            in_specs=[pl.BlockSpec((d, tb), lambda i: (0, i))],
            out_specs=pl.BlockSpec((m, tb), lambda i: (0, i)),
            compiler_params=pltpu.CompilerParams(
                dimension_semantics=("parallel",)),      # 2-TC sharding on v7x; harmless elsewhere
        )(xt)

        return out_t.T.reshape(batch_shape + (m,))


# ---------------- pure-JAX references (for correctness check) ----------------
def _ref_exponential_spacing(X, descending=False):
    eps = jnp.finfo(X.dtype).eps
    y = -jnp.log(eps + (1 - eps) * X)
    csum = jnp.cumsum(y, axis=-1)
    out = csum[..., :-1] / csum[..., -1:]
    return jnp.flip(out, axis=-1) if descending else out


def _ref_scale(X, descending=False):
    m = X.shape[-1]
    powers = jnp.array([1.0 / (m - i) for i in range(m)], dtype=X.dtype)
    out = jnp.cumprod(X ** powers, axis=-1)
    return out if descending else jnp.flip(out, axis=-1)


if __name__ == "__main__":
    key = jax.random.PRNGKey(0)
    num_objectives = 4
    batch = 8
    k1, k2, k3 = jax.random.split(key, 3)
    rtol, atol = 2e-5, 2e-6

    # --- exponential_spacing (default transform): latent_dim = num_objectives + 1
    X_exp = jax.random.uniform(k1, (batch, num_objectives + 1), dtype=jnp.float32)
    for desc in (False, True):
        mod = OrderedUniformPallas(num_objectives, descending=desc,
                                   transform_label="exponential_spacing")
        out = jax.block_until_ready(mod(X_exp))
        ref = _ref_exponential_spacing(X_exp, descending=desc)
        np.testing.assert_allclose(np.asarray(out), np.asarray(ref),
                                   rtol=rtol, atol=atol)

    # --- scale transform: latent_dim = num_objectives
    X_sc = jax.random.uniform(k2, (2, batch, num_objectives), dtype=jnp.float32)
    for desc in (False, True):
        mod = OrderedUniformPallas(num_objectives, descending=desc,
                                   transform_label="scale")
        out = jax.block_until_ready(mod(X_sc))
        ref = _ref_scale(X_sc, descending=desc)
        np.testing.assert_allclose(np.asarray(out), np.asarray(ref),
                                   rtol=rtol, atol=atol)

    # --- tiled batch path (grid > 1, partial last block) -------------------------
    X_big = jax.random.uniform(k3, (1000, num_objectives + 1), dtype=jnp.float32)
    mod_big = OrderedUniformPallas(num_objectives, descending=False,
                                   transform_label="exponential_spacing",
                                   block_batch=256)
    out_big = jax.block_until_ready(mod_big(X_big))
    ref_big = _ref_exponential_spacing(X_big, descending=False)
    np.testing.assert_allclose(np.asarray(out_big), np.asarray(ref_big),
                               rtol=rtol, atol=atol)

    print("KERNEL_OK")
</pallas_src>

<mosaic_0001>
module attributes {stable_mosaic.version = 11 : i64} {
  func.func @_exp_spacing_kernel(%arg0: i32, %arg1: memref<5x8xf32, #tpu.memory_space<vmem>>, %arg2: memref<4x8xf32, #tpu.memory_space<vmem>>) attributes {dimension_semantics = [#tpu.dimension_semantics<parallel>], iteration_bounds = array<i64: 1>, scalar_prefetch = 0 : i64, scratch_operands = 0 : i64, tpu.core_type = #tpu.core_type<tc>, window_params = [{transform_indices = @transform_0, window_bounds = array<i64: 5, 8>}, {transform_indices = @transform_1, window_bounds = array<i64: 4, 8>}]} {
    %c0 = arith.constant 0 : index
    %c0_0 = arith.constant 0 : index
    %0 = vector.load %arg1[%c0, %c0_0] : memref<5x8xf32, #tpu.memory_space<vmem>>, vector<5x8xf32>
    %cst = arith.constant 0.99999988 : f32
    %1 = vector.broadcast %cst : f32 to vector<5x8xf32>
    %2 = arith.mulf %1, %0 : vector<5x8xf32>
    %cst_1 = arith.constant 1.1920929E-7 : f32
    %3 = vector.broadcast %cst_1 : f32 to vector<5x8xf32>
    %4 = arith.addf %3, %2 : vector<5x8xf32>
    %5 = math.log %4 : vector<5x8xf32>
    %cst_2 = arith.constant 0.000000e+00 : f32
    %6 = vector.broadcast %cst_2 : f32 to vector<5x8xf32>
    %7 = arith.subf %6, %5 : vector<5x8xf32>
    %8 = vector.extract_strided_slice %7 {offsets = [0, 0], sizes = [1, 8], strides = [1, 1]} : vector<5x8xf32> to vector<1x8xf32>
    %9 = vector.extract_strided_slice %7 {offsets = [1, 0], sizes = [1, 8], strides = [1, 1]} : vector<5x8xf32> to vector<1x8xf32>
    %10 = arith.addf %8, %9 : vector<1x8xf32>
    %11 = vector.extract_strided_slice %7 {offsets = [2, 0], sizes = [1, 8], strides = [1, 1]} : vector<5x8xf32> to vector<1x8xf32>
    %12 = arith.addf %10, %11 : vector<1x8xf32>
    %13 = vector.extract_strided_slice %7 {offsets = [3, 0], sizes = [1, 8], strides = [1, 1]} : vector<5x8xf32> to vector<1x8xf32>
    %14 = arith.addf %12, %13 : vector<1x8xf32>
    %15 = vector.extract_strided_slice %7 {offsets = [4, 0], sizes = [1, 8], strides = [1, 1]} : vector<5x8xf32> to vector<1x8xf32>
    %16 = arith.addf %14, %15 : vector<1x8xf32>
    %17 = tpu.reciprocal %16 {approx = true} : vector<1x8xf32> -> vector<1x8xf32>
    %18 = arith.mulf %16, %17 : vector<1x8xf32>
    %cst_3 = arith.constant 2.000000e+00 : f32
    %19 = vector.broadcast %cst_3 : f32 to vector<1x8xf32>
    %20 = arith.subf %19, %18 : vector<1x8xf32>
    %21 = arith.mulf %17, %20 : vector<1x8xf32>
    %22 = arith.mulf %16, %21 : vector<1x8xf32>
    %cst_4 = arith.constant 2.000000e+00 : f32
    %23 = vector.broadcast %cst_4 : f32 to vector<1x8xf32>
    %24 = arith.subf %23, %22 : vector<1x8xf32>
    %25 = arith.mulf %21, %24 : vector<1x8xf32>
    %26 = arith.mulf %8, %25 : vector<1x8xf32>
    %27 = arith.mulf %10, %25 : vector<1x8xf32>
    %28 = arith.mulf %12, %25 : vector<1x8xf32>
    %29 = arith.mulf %14, %25 : vector<1x8xf32>
    %30 = tpu.concatenate %26, %27, %28, %29 in 0 : vector<1x8xf32>, vector<1x8xf32>, vector<1x8xf32>, vector<1x8xf32> -> vector<4x8xf32>
    %c0_5 = arith.constant 0 : index
    %c0_6 = arith.constant 0 : index
    %31 = vector.load %arg2[%c0_5, %c0_6] : memref<4x8xf32, #tpu.memory_space<vmem>>, vector<4x8xf32>
    tpu.vector_store %arg2[%c0_5, %c0_6], %30 {strides = array<i32>} : memref<4x8xf32, #tpu.memory_space<vmem>>, vector<4x8xf32>,
    return
  }
  func.func @transform_0(%arg0: i32) -> (i32, i32) {
    %c0_i32 = arith.constant 0 : i32
    %c0_i32_0 = arith.constant 0 : i32
    return %c0_i32, %arg0 : i32, i32
  }
  func.func @transform_1(%arg0: i32) -> (i32, i32) {
    %c0_i32 = arith.constant 0 : i32
    %c0_i32_0 = arith.constant 0 : i32
    return %c0_i32, %arg0 : i32, i32
  }
}

</mosaic_0001>

<bundles_post_ra>
// kernel: tpu_custom_call.1
= control target key start
LH: loop header
LB: loop body
LE: loop exit
PB: predicated region body
PF: predicated region fallthrough
CT: control target
= control target key end

     0   :  { %6 = vsyncpa [#allocation3], 0  ;;  %s173_s0 = inlined_call_operand.hbm [shape: f32[5,8], index: 0, kind: input, shape index: {}]   ;;  %s174_s1 = inlined_call_operand.hbm [shape: f32[4,8], index: 1, kind: output, shape index: {}]  }
   0x1   :  { %7 = vsyncpa [#allocation4], 0  ;;  %s137_s6 = smov [#allocation2]   ;;  %s89_s10 = scalar_lea.hbm %s173_s0, 128 }
   0x2   :  { %s14_s7 = sshll.u32 %s137_s6, 4  ;;  %p90_p0 = scmp.ne.s32.totalorder %s173_s0, %s89_s10  ;;  %s15_s7 = int_to_ptr.vmem [resolvable:$true] %s14_s7 }
   0x3   :  { %p93_p1 = scmp.lt.u32.totalorder %s89_s10, %s173_s0 }
   0x5   :  { %p95_p2 = pnand %p93_p1, %p90_p0 }
   0x7   :  { %98 = shalt.err (!%p95_p2)
}
   0x8   :  { %s99_s15 = scalar_lea.vmem %s15_s7, 128  ;;  %p104_p4 = scmp.lt.s32.totalorder %s15_s7, %s15_s7 }
   0x9   :  { %p100_p3 = scmp.ne.s32.totalorder %s15_s7, %s99_s15  ;;  %p105_p5 = scmp.lt.s32.totalorder %s99_s15, %s99_s15 }
   0xb   :  { %p106_p6 = por %p105_p5, %p104_p4 }
   0xd   :  { %p107_p7 = pnand %p106_p6, %p100_p3 }
   0xf   :  { %110 = shalt.err (!%p107_p7)
}
  0x10   :  { %17 = dma.hbm_to_vmem [thread:$0]  %s173_s0, 128, %s15_s7, [#allocation3]  }
  0x11   :  { %133 = dma.done.wait [#allocation3], 128  }
  0x12   :  { %134 = vsyncadd [#allocation3], 4294967168  ;;  %v21_v0 = vld [vmem:[#allocation2] sm:$0x1f]  ;;  %vm60_vm0 = vcmask 1040384   ;;  %vm62_vm1 = vcmask 1041408  }
  0x13   :  { %v22_v1 = vmul.f32 0.9999999, %v21_v0  ;;  %s138_s0 = smov [#allocation5]   ;;  %vm64_vm2 = vcmask 1042432   ;;  %vm66_vm3 = vcmask 60416  }
  0x14   :  { %s74_s18 = sshll.u32 %s138_s0, 4  ;;  %s75_s18 = int_to_ptr.vmem [resolvable:$true] %s74_s18 }
  0x15   :  { %v23_v2 = vadd.f32 1.1920929e-07, %v22_v1  ;;  %s111_s19 = scalar_lea.vmem %s75_s18, 64  ;;  %p116_p9 = scmp.lt.s32.totalorder %s75_s18, %s75_s18 }
  0x16   :  { %p112_p8 = scmp.ne.s32.totalorder %s75_s18, %s111_s19  ;;  %p117_p10 = scmp.lt.s32.totalorder %s111_s19, %s111_s19 }
  0x17   :  { %85 = vlog2.f32 %v23_v2 }
  0x18   :  { %p118_p11 = por %p117_p10, %p116_p9 }
  0x1a   :  { %p119_p12 = pnand %p118_p11, %p112_p8 }
  0x21   :  { %v86_v3 = vpop.eup %85 }
  0x22   :  { %v25_v4 = vmul.f32 0.6931472, %v86_v3 }
  0x24   :  { %v26_v5 = vsub.f32 0.0, %v25_v4 }
  0x26   :  { %v28_v6 = vrot.slane %v26_v5, 1  ;;  %v31_v7 = vrot.slane %v26_v5, 2  ;;  %v34_v9 = vrot.slane %v26_v5, 3  ;;  %v37_v11 = vrot.slane %v26_v5, 4 }
  0x28   :  { %v30_v8 = vadd.f32 %v28_v6, %v26_v5 }
  0x2a   :  { %v33_v10 = vadd.f32 %v31_v7, %v30_v8 }
  0x2c   :  { %v36_v12 = vadd.f32 %v34_v9, %v33_v10 }
  0x2e   :  { %v39_v13 = vadd.f32 %v37_v11, %v36_v12 }
  0x30   :  { %87 = vrcp.f32 %v39_v13 }
  0x3a   :  { %v88_v14 = vpop.eup %87 }
  0x3b   :  { %v41_v15 = vmul.f32 %v88_v14, %v39_v13 }
  0x3d   :  { %v42_v16 = vsub.f32 2.0, %v41_v15 }
  0x3f   :  { %v43_v17 = vmul.f32 %v88_v14, %v42_v16 }
  0x41   :  { %v44_v18 = vmul.f32 %v43_v17, %v39_v13 }
  0x43   :  { %v45_v19 = vsub.f32 2.0, %v44_v18 }
  0x45   :  { %v46_v20 = vmul.f32 %v45_v19, %v43_v17 }
  0x47   :  { %v47_v21 = vmul.f32 %v46_v20, %v26_v5  ;;  %v48_v22 = vmul.f32 %v46_v20, %v30_v8  ;;  %v49_v23 = vmul.f32 %v46_v20, %v33_v10  ;;  %v50_v24 = vmul.f32 %v46_v20, %v36_v12 }
  0x49   :  { %v52_v25 = vrot.slane %v48_v22, 7  ;;  %v55_v26 = vrot.slane %v49_v23, 6  ;;  %v58_v27 = vrot.slane %v50_v24, 5 }
  0x4b   :  { %v61_v28 = vsel %vm60_vm0, %v47_v21, %v52_v25 }
  0x4c   :  { %v63_v29 = vsel %vm62_vm1, %v61_v28, %v55_v26 }
  0x4d   :  { %v65_v30 = vsel %vm64_vm2, %v63_v29, %v58_v27 }
  0x4e   :  { %67 = vst.msk [vmem:[#allocation5] sm:$0xf] %vm66_vm3, %v65_v30 }
  0x4f   :  { %122 = shalt.err (!%p119_p12)
}
  0x50   :  { %s123_s22 = scalar_lea.hbm %s174_s1, 64 }
  0x51   :  { %p124_p13 = scmp.ne.s32.totalorder %s174_s1, %s123_s22  ;;  %p127_p0 = scmp.lt.u32.totalorder %s123_s22, %s174_s1 }
  0x53   :  { %p129_p1 = pnand %p127_p0, %p124_p13 }
  0x55   :  { %132 = shalt.err (!%p129_p1)
}
  0x56   :  { %77 = dma.vmem_to_hbm [thread:$0]  %s75_s18, 64, %s174_s1, [#allocation4]  }
  0x57   :  { %135 = dma.done.wait [#allocation4], 64  }
  0x58   :  { %136 = vsyncadd [#allocation4], 4294967232 }
  0x59   :  { %81 = vsyncpa [#allocation3], 1 }
  0x5a   :  { %82 = vsyncpa [#allocation4], 1 }

</bundles_post_ra>
